<compile_context>
chip_gen: v7x
topology: tpu7x:2x2x1
jax: 0.10.0
libtpu: 0.0.40
codegen_flags: <defaults>
</compile_context>

<pallas_src>
import jax
import jax.numpy as jnp
from jax.experimental import pallas as pl
from jax.experimental.pallas import tpu as pltpu

BN_EPS = 1e-5


def _round_up(x, m):
    return (x + m - 1) // m * m


# --------------------------------------------------------------------------
# Kernel: two branch MLPs (Linear -> ReLU), fc2 split per branch, all f32.
# Dropout(p=0.2) is identity in eval; BatchNorm(eval) folded into w2t/w2i/b2.
# --------------------------------------------------------------------------
def late_fusion_kernel(text_ref, image_ref, wt_ref, bt_ref, wi_ref, bi_ref,
                       w2t_ref, w2i_ref, b2_ref, out_ref):
    h_t = jnp.maximum(
        jnp.dot(text_ref[...], wt_ref[...], preferred_element_type=jnp.float32)
        + bt_ref[...], 0.0)
    h_i = jnp.maximum(
        jnp.dot(image_ref[...], wi_ref[...], preferred_element_type=jnp.float32)
        + bi_ref[...], 0.0)
    # fc2 over the implicit concat([h_t, h_i]) without materializing a lane
    # concat: two partial matmuls into the same output tile.
    out_ref[...] = (
        jnp.dot(h_t, w2t_ref[...], preferred_element_type=jnp.float32)
        + jnp.dot(h_i, w2i_ref[...], preferred_element_type=jnp.float32)
        + b2_ref[...])


# --------------------------------------------------------------------------
# Wrapper
# --------------------------------------------------------------------------
def late_fusion_forward(text, image, fused):
    """text: [B, D_text] f32, image: [B, D_image] f32 -> [B, O] f32."""
    B, Dt = text.shape
    Di = image.shape[1]
    Ht = fused["wt"].shape[1]
    Hi = fused["wi"].shape[1]
    O = fused["w2t"].shape[1]

    # Batch tiling: cap block at 1024 rows to amortize per-step overhead, and
    # split into >=2 blocks whenever possible so the "parallel" axis shards
    # across both TensorCores on v7x (no-op on v5e/v6e's single TC).
    B8 = _round_up(B, 8)
    block_b = min(1024, _round_up(pl.cdiv(B8, 2), 8))
    B_pad = _round_up(B8, block_b)
    if B_pad != B:
        # Pad the (narrow) raw inputs only when needed — no concat pass.
        text = jnp.pad(text, ((0, B_pad - B), (0, 0)))
        image = jnp.pad(image, ((0, B_pad - B), (0, 0)))
    grid = (B_pad // block_b,)

    out = pl.pallas_call(
        late_fusion_kernel,
        out_shape=jax.ShapeDtypeStruct((B_pad, O), jnp.float32),
        grid_spec=pltpu.PrefetchScalarGridSpec(
            num_scalar_prefetch=0,
            grid=grid,
            in_specs=[
                pl.BlockSpec((block_b, Dt), lambda i: (i, 0)),  # text batch tile
                pl.BlockSpec((block_b, Di), lambda i: (i, 0)),  # image batch tile
                pl.BlockSpec((Dt, Ht), lambda i: (0, 0)),       # weights resident
                pl.BlockSpec((1, Ht), lambda i: (0, 0)),
                pl.BlockSpec((Di, Hi), lambda i: (0, 0)),
                pl.BlockSpec((1, Hi), lambda i: (0, 0)),
                pl.BlockSpec((Ht, O), lambda i: (0, 0)),
                pl.BlockSpec((Hi, O), lambda i: (0, 0)),
                pl.BlockSpec((1, O), lambda i: (0, 0)),
            ],
            out_specs=pl.BlockSpec((block_b, O), lambda i: (i, 0)),
        ),
        compiler_params=pltpu.CompilerParams(
            dimension_semantics=("parallel",),
            vmem_limit_bytes=32 * 1024 * 1024,
        ),
    )(text, image, fused["wt"], fused["bt"], fused["wi"], fused["bi"],
      fused["w2t"], fused["w2i"], fused["b2"])

    return out[:B]


# --------------------------------------------------------------------------
# Parameter construction
# --------------------------------------------------------------------------
def init_params(key, text_input_size, image_input_size, output_size,
                hidden_text=64, hidden_images=64):
    """Raw (PyTorch-layout-equivalent) params with non-trivial BN stats."""
    ks = jax.random.split(key, 12)

    def linear(k, d_in, d_out):
        # nn.Linear stores [out, in]; we store transposed [in, out].
        bound = 1.0 / jnp.sqrt(jnp.float32(d_in))
        w = jax.random.uniform(k, (d_in, d_out), jnp.float32, -bound, bound)
        b = jax.random.uniform(jax.random.fold_in(k, 1), (1, d_out),
                               jnp.float32, -bound, bound)
        return w, b

    wt, bt = linear(ks[0], text_input_size, hidden_text)
    wi, bi = linear(ks[1], image_input_size, hidden_images)
    w2, b2 = linear(ks[2], hidden_text + hidden_images, output_size)

    def bn(kg, kb, km, kv, h):
        g = jax.random.uniform(kg, (1, h), jnp.float32, 0.5, 1.5)
        be = 0.2 * jax.random.normal(kb, (1, h), jnp.float32)
        rm = 0.2 * jax.random.normal(km, (1, h), jnp.float32)
        rv = jax.random.uniform(kv, (1, h), jnp.float32, 0.5, 1.5)
        return g, be, rm, rv

    gt, bet, rmt, rvt = bn(ks[3], ks[4], ks[5], ks[6], hidden_text)
    gi, bei, rmi, rvi = bn(ks[7], ks[8], ks[9], ks[10], hidden_images)

    return dict(
        wt=wt, bt=bt, gt=gt, bet=bet, rmt=rmt, rvt=rvt,
        wi=wi, bi=bi, gi=gi, bei=bei, rmi=rmi, rvi=rvi,
        w2=w2, b2=b2,
    )


def fuse_params(p):
    """Fold eval-mode BN into fc2 and split fc2 per branch. Everything f32."""
    Ht = p["wt"].shape[1]

    # BN(eval): y = h*scale + shift
    scale_t = p["gt"] * jax.lax.rsqrt(p["rvt"] + BN_EPS)   # [1, Ht]
    shift_t = p["bet"] - p["rmt"] * scale_t
    scale_i = p["gi"] * jax.lax.rsqrt(p["rvi"] + BN_EPS)   # [1, Hi]
    shift_i = p["bei"] - p["rmi"] * scale_i

    w2t = p["w2"][:Ht]                                     # [Ht, O]
    w2i = p["w2"][Ht:]                                     # [Hi, O]

    # Fold: (h*scale + shift) @ w2 + b2  ->  h @ (scale.T*w2) + (b2 + shift@w2)
    w2t_f = scale_t.T * w2t
    w2i_f = scale_i.T * w2i
    b2_f = p["b2"] + shift_t @ w2t + shift_i @ w2i

    return dict(
        wt=p["wt"].astype(jnp.float32), bt=p["bt"].astype(jnp.float32),
        wi=p["wi"].astype(jnp.float32), bi=p["bi"].astype(jnp.float32),
        w2t=w2t_f.astype(jnp.float32), w2i=w2i_f.astype(jnp.float32),
        b2=b2_f.astype(jnp.float32),
    )


# --------------------------------------------------------------------------
# Pure-JAX f32 reference of the eval-mode PyTorch forward
# --------------------------------------------------------------------------
def reference_forward(text, image, p):
    t = jnp.maximum(text @ p["wt"] + p["bt"], 0.0)
    t = (t - p["rmt"]) / jnp.sqrt(p["rvt"] + BN_EPS) * p["gt"] + p["bet"]
    im = jnp.maximum(image @ p["wi"] + p["bi"], 0.0)
    im = (im - p["rmi"]) / jnp.sqrt(p["rvi"] + BN_EPS) * p["gi"] + p["bei"]
    x = jnp.concatenate([t, im], axis=1)
    return x @ p["w2"] + p["b2"]


if __name__ == "__main__":
    B = 8
    TEXT_DIM = 32
    IMAGE_DIM = 16
    OUTPUT = 8
    H = 64  # per branch -> fused hidden = 128

    key = jax.random.PRNGKey(0)
    k_text, k_image, k_params = jax.random.split(key, 3)

    text = jax.random.normal(k_text, (B, TEXT_DIM), jnp.float32)
    image = jax.random.normal(k_image, (B, IMAGE_DIM), jnp.float32)

    raw = init_params(k_params, TEXT_DIM, IMAGE_DIM, OUTPUT,
                      hidden_text=H, hidden_images=H)
    fused = fuse_params(raw)

    out = late_fusion_forward(text, image, fused)
    out = jax.block_until_ready(out)

    ref = reference_forward(text, image, raw)
    assert out.shape == (B, OUTPUT)
    # All-f32 kernel path; tolerance covers MXU default-precision matmuls.
    assert jnp.allclose(out, ref, atol=2e-2, rtol=2e-2), "mismatch vs reference"

    print("KERNEL_OK")
</pallas_src>

<mosaic_0001>
module attributes {stable_mosaic.version = 11 : i64} {
  func.func @late_fusion_kernel(%arg0: i32, %arg1: memref<8x32xf32, #tpu.memory_space<vmem>>, %arg2: memref<8x16xf32, #tpu.memory_space<vmem>>, %arg3: memref<32x64xf32, #tpu.memory_space<vmem>>, %arg4: memref<1x64xf32, #tpu.memory_space<vmem>>, %arg5: memref<16x64xf32, #tpu.memory_space<vmem>>, %arg6: memref<1x64xf32, #tpu.memory_space<vmem>>, %arg7: memref<64x8xf32, #tpu.memory_space<vmem>>, %arg8: memref<64x8xf32, #tpu.memory_space<vmem>>, %arg9: memref<1x8xf32, #tpu.memory_space<vmem>>, %arg10: memref<8x8xf32, #tpu.memory_space<vmem>>) attributes {dimension_semantics = [#tpu.dimension_semantics<parallel>], iteration_bounds = array<i64: 1>, scalar_prefetch = 0 : i64, scratch_operands = 0 : i64, tpu.core_type = #tpu.core_type<tc>, window_params = [{transform_indices = @transform_0, window_bounds = array<i64: 8, 32>}, {transform_indices = @transform_1, window_bounds = array<i64: 8, 16>}, {pipeline_mode = #tpu.pipeline_mode<synchronous>, transform_indices = @transform_2, window_bounds = array<i64: 32, 64>}, {pipeline_mode = #tpu.pipeline_mode<synchronous>, transform_indices = @transform_3, window_bounds = array<i64: 1, 64>}, {pipeline_mode = #tpu.pipeline_mode<synchronous>, transform_indices = @transform_4, window_bounds = array<i64: 16, 64>}, {pipeline_mode = #tpu.pipeline_mode<synchronous>, transform_indices = @transform_5, window_bounds = array<i64: 1, 64>}, {pipeline_mode = #tpu.pipeline_mode<synchronous>, transform_indices = @transform_6, window_bounds = array<i64: 64, 8>}, {pipeline_mode = #tpu.pipeline_mode<synchronous>, transform_indices = @transform_7, window_bounds = array<i64: 64, 8>}, {pipeline_mode = #tpu.pipeline_mode<synchronous>, transform_indices = @transform_8, window_bounds = array<i64: 1, 8>}, {transform_indices = @transform_9, window_bounds = array<i64: 8, 8>}]} {
    %c0 = arith.constant 0 : index
    %c0_0 = arith.constant 0 : index
    %0 = vector.load %arg1[%c0, %c0_0] : memref<8x32xf32, #tpu.memory_space<vmem>>, vector<8x32xf32>
    %c0_1 = arith.constant 0 : index
    %c0_2 = arith.constant 0 : index
    %1 = vector.load %arg3[%c0_1, %c0_2] : memref<32x64xf32, #tpu.memory_space<vmem>>, vector<32x64xf32>
    %cst = arith.constant dense<0.000000e+00> : vector<8x64xf32>
    %2 = tpu.matmul %0, %1, %cst {dimension_numbers = #tpu.dot_dimension_numbers<[1], [0], [0], [1], [0, 0, 1, 1], [], []>} : vector<8x32xf32>, vector<32x64xf32>, vector<8x64xf32> -> vector<8x64xf32>
    %c0_3 = arith.constant 0 : index
    %c0_4 = arith.constant 0 : index
    %3 = vector.load %arg4[%c0_3, %c0_4] : memref<1x64xf32, #tpu.memory_space<vmem>>, vector<1x64xf32>
    %4 = vector.broadcast %3 : vector<1x64xf32> to vector<8x64xf32>
    %5 = arith.addf %2, %4 : vector<8x64xf32>
    %cst_5 = arith.constant 0.000000e+00 : f32
    %6 = vector.broadcast %cst_5 : f32 to vector<8x64xf32>
    %7 = arith.maximumf %5, %6 : vector<8x64xf32>
    %c0_6 = arith.constant 0 : index
    %c0_7 = arith.constant 0 : index
    %8 = vector.load %arg2[%c0_6, %c0_7] : memref<8x16xf32, #tpu.memory_space<vmem>>, vector<8x16xf32>
    %c0_8 = arith.constant 0 : index
    %c0_9 = arith.constant 0 : index
    %9 = vector.load %arg5[%c0_8, %c0_9] : memref<16x64xf32, #tpu.memory_space<vmem>>, vector<16x64xf32>
    %cst_10 = arith.constant dense<0.000000e+00> : vector<8x64xf32>
    %10 = tpu.matmul %8, %9, %cst_10 {dimension_numbers = #tpu.dot_dimension_numbers<[1], [0], [0], [1], [0, 0, 1, 1], [], []>} : vector<8x16xf32>, vector<16x64xf32>, vector<8x64xf32> -> vector<8x64xf32>
    %c0_11 = arith.constant 0 : index
    %c0_12 = arith.constant 0 : index
    %11 = vector.load %arg6[%c0_11, %c0_12] : memref<1x64xf32, #tpu.memory_space<vmem>>, vector<1x64xf32>
    %12 = vector.broadcast %11 : vector<1x64xf32> to vector<8x64xf32>
    %13 = arith.addf %10, %12 : vector<8x64xf32>
    %cst_13 = arith.constant 0.000000e+00 : f32
    %14 = vector.broadcast %cst_13 : f32 to vector<8x64xf32>
    %15 = arith.maximumf %13, %14 : vector<8x64xf32>
    %c0_14 = arith.constant 0 : index
    %c0_15 = arith.constant 0 : index
    %16 = vector.load %arg7[%c0_14, %c0_15] : memref<64x8xf32, #tpu.memory_space<vmem>>, vector<64x8xf32>
    %cst_16 = arith.constant dense<0.000000e+00> : vector<8x8xf32>
    %17 = tpu.matmul %7, %16, %cst_16 {dimension_numbers = #tpu.dot_dimension_numbers<[1], [0], [0], [1], [0, 0, 1, 1], [], []>} : vector<8x64xf32>, vector<64x8xf32>, vector<8x8xf32> -> vector<8x8xf32>
    %c0_17 = arith.constant 0 : index
    %c0_18 = arith.constant 0 : index
    %18 = vector.load %arg8[%c0_17, %c0_18] : memref<64x8xf32, #tpu.memory_space<vmem>>, vector<64x8xf32>
    %cst_19 = arith.constant dense<0.000000e+00> : vector<8x8xf32>
    %19 = tpu.matmul %15, %18, %cst_19 {dimension_numbers = #tpu.dot_dimension_numbers<[1], [0], [0], [1], [0, 0, 1, 1], [], []>} : vector<8x64xf32>, vector<64x8xf32>, vector<8x8xf32> -> vector<8x8xf32>
    %20 = arith.addf %17, %19 : vector<8x8xf32>
    %c0_20 = arith.constant 0 : index
    %c0_21 = arith.constant 0 : index
    %21 = vector.load %arg9[%c0_20, %c0_21] : memref<1x8xf32, #tpu.memory_space<vmem>>, vector<1x8xf32>
    %22 = vector.broadcast %21 : vector<1x8xf32> to vector<8x8xf32>
    %23 = arith.addf %20, %22 : vector<8x8xf32>
    %c0_22 = arith.constant 0 : index
    %c0_23 = arith.constant 0 : index
    %24 = vector.load %arg10[%c0_22, %c0_23] : memref<8x8xf32, #tpu.memory_space<vmem>>, vector<8x8xf32>
    tpu.vector_store %arg10[%c0_22, %c0_23], %23 {strides = array<i32>} : memref<8x8xf32, #tpu.memory_space<vmem>>, vector<8x8xf32>,
    return
  }
  func.func @transform_0(%arg0: i32) -> (i32, i32) {
    %c0_i32 = arith.constant 0 : i32
    %c0_i32_0 = arith.constant 0 : i32
    return %arg0, %c0_i32 : i32, i32
  }
  func.func @transform_1(%arg0: i32) -> (i32, i32) {
    %c0_i32 = arith.constant 0 : i32
    %c0_i32_0 = arith.constant 0 : i32
    return %arg0, %c0_i32 : i32, i32
  }
  func.func @transform_2(%arg0: i32) -> (i32, i32) {
    %c0_i32 = arith.constant 0 : i32
    %c0_i32_0 = arith.constant 0 : i32
    %c0_i32_1 = arith.constant 0 : i32
    return %c0_i32, %c0_i32_0 : i32, i32
  }
  func.func @transform_3(%arg0: i32) -> (i32, i32) {
    %c0_i32 = arith.constant 0 : i32
    %c0_i32_0 = arith.constant 0 : i32
    %c0_i32_1 = arith.constant 0 : i32
    return %c0_i32, %c0_i32_0 : i32, i32
  }
  func.func @transform_4(%arg0: i32) -> (i32, i32) {
    %c0_i32 = arith.constant 0 : i32
    %c0_i32_0 = arith.constant 0 : i32
    %c0_i32_1 = arith.constant 0 : i32
    return %c0_i32, %c0_i32_0 : i32, i32
  }
  func.func @transform_5(%arg0: i32) -> (i32, i32) {
    %c0_i32 = arith.constant 0 : i32
    %c0_i32_0 = arith.constant 0 : i32
    %c0_i32_1 = arith.constant 0 : i32
    return %c0_i32, %c0_i32_0 : i32, i32
  }
  func.func @transform_6(%arg0: i32) -> (i32, i32) {
    %c0_i32 = arith.constant 0 : i32
    %c0_i32_0 = arith.constant 0 : i32
    %c0_i32_1 = arith.constant 0 : i32
    return %c0_i32, %c0_i32_0 : i32, i32
  }
  func.func @transform_7(%arg0: i32) -> (i32, i32) {
    %c0_i32 = arith.constant 0 : i32
    %c0_i32_0 = arith.constant 0 : i32
    %c0_i32_1 = arith.constant 0 : i32
    return %c0_i32, %c0_i32_0 : i32, i32
  }
  func.func @transform_8(%arg0: i32) -> (i32, i32) {
    %c0_i32 = arith.constant 0 : i32
    %c0_i32_0 = arith.constant 0 : i32
    %c0_i32_1 = arith.constant 0 : i32
    return %c0_i32, %c0_i32_0 : i32, i32
  }
  func.func @transform_9(%arg0: i32) -> (i32, i32) {
    %c0_i32 = arith.constant 0 : i32
    %c0_i32_0 = arith.constant 0 : i32
    return %arg0, %c0_i32 : i32, i32
  }
}

</mosaic_0001>

<bundles_post_ra>
// kernel: tpu_custom_call.1
= control target key start
LH: loop header
LB: loop body
LE: loop exit
PB: predicated region body
PF: predicated region fallthrough
CT: control target
= control target key end

     0   :  { %v542_v3 = vmov 0.0|0.0   ;;  %vm543_vm0 = vmmov 0   ;;  %v544_v9 = vmov 0.0   ;;  %vm130_vm1 = vcmask 130048   ;;  %s693_s0 = inlined_call_operand.vmem [shape: f32[8,32], index: 0, kind: input, shape index: {}]   ;;  %s694_s1 = inlined_call_operand.vmem [shape: f32[8,16], index: 1, kind: input, shape index: {}]   ;;  %s695_s2 = inlined_call_operand.vmem [shape: f32[32,64], index: 2, kind: input, shape index: {}]   ;;  %s696_s3 = inlined_call_operand.vmem [shape: f32[1,64], index: 3, kind: input, shape index: {}]   ;;  %s697_s4 = inlined_call_operand.vmem [shape: f32[16,64], index: 4, kind: input, shape index: {}]   ;;  %s698_s5 = inlined_call_operand.vmem [shape: f32[1,64], index: 5, kind: input, shape index: {}]   ;;  %s699_s6 = inlined_call_operand.vmem [shape: f32[64,8], index: 6, kind: input, shape index: {}]   ;;  %s700_s7 = inlined_call_operand.vmem [shape: f32[64,8], index: 7, kind: input, shape index: {}]   ;;  %s701_s8 = inlined_call_operand.vmem [shape: f32[1,8], index: 8, kind: input, shape index: {}]   ;;  %s702_s9 = inlined_call_operand.hbm [shape: f32[8,8], index: 9, kind: output, shape index: {}]  }
   0x1   :  { %v34_v0 = vld [vmem:[%s695_s2] sm:$0xff]  ;;  %v35_v1 = vld [vmem:[%s695_s2 + $0x8] sm:$0xff]  ;;  %481 = vmatprep.subr.bf16.mxu0 %v542_v3  ;;  %487 = vmatprep.subr.bf16.mxu1 %v542_v3  ;;  %v36_v6 = vld [vmem:[%s695_s2 + $0x10] sm:$0xff]  ;;  %vm45_vm2 = vcmask 261120  }
   0x2   :  { %v121_v2 = vld [vmem:[%s697_s4] sm:$0xff]  ;;  %v482_v4 = vpack.c.bf16 %v35_v1, %v34_v0  ;;  %v122_v5 = vld [vmem:[%s697_s4 + $0x8] sm:$0xff]  ;;  %v37_v7 = vld [vmem:[%s695_s2 + $0x18] sm:$0xff]  ;;  %440 = vmatprep.mubr.msk.f32.mxu1 %vm543_vm0, %v544_v9  ;;  %433 = vmatprep.mubr.msk.f32.mxu0 %vm543_vm0, %v544_v9 }
   0x3   :  { %v488_v8 = vpack.c.bf16 %v122_v5, %v121_v2  ;;  %v213_v10 = vld [vmem:[%s700_s7] sm:$0xff]  ;;  %v485_v11 = vpack.c.bf16 %v37_v7, %v36_v6  ;;  %v214_v12 = vld [vmem:[%s700_s7 + $0x8] sm:$0xff]  ;;  %v215_v17 = vld [vmem:[%s700_s7 + $0x10] sm:$0xff] }
   0x4   :  { %483 = vmatpush3.bf16.msra.mxu0 %v482_v4  ;;  %v120_v13 = vld [vmem:[%s694_s1] sm:$0xff]  ;;  %v491_v14 = vpack.c.bf16 %v214_v12, %v213_v10  ;;  %v206_v16 = vld [vmem:[%s699_s6 + $0x8] sm:$0xff]  ;;  %v216_v18 = vld [vmem:[%s700_s7 + $0x18] sm:$0xff] }
   0x5   :  { %484 = vmatprep.subr.bf16.mxu0 %v542_v3  ;;  %489 = vmatpush3.bf16.msra.mxu1 %v488_v8  ;;  %v205_v15 = vld [vmem:[%s699_s6] sm:$0xff] }
   0x6   :  { %490 = vmatprep.subr.bf16.mxu1 %v542_v3  ;;  %v33_v19 = vld [vmem:[%s693_s0] sm:$0xff]  ;;  %v503_v20 = vpack.c.bf16 %v206_v16, %v205_v15 }
   0x8   :  { %486 = vmatpush3.bf16.msra.mxu0 %v485_v11  ;;  %441 = vmatmul.mubr.msk.f32.vlgmr.msra.gmra.mrb[0].mxu1 %vm130_vm1, %v120_v13 }
   0x9   :  { %14 = vsyncpa [#allocation3], 0  ;;  %492 = vmatpush3.bf16.msra.mxu1 %v491_v14  ;;  %502 = vmatprep.subr.bf16.mxu0 %v542_v3  ;;  %v494_v21 = vpack.c.bf16 %v216_v18, %v215_v17  ;;  %v207_v22 = vld [vmem:[%s699_s6 + $0x10] sm:$0xff]  ;;  %v208_v23 = vld [vmem:[%s699_s6 + $0x18] sm:$0xff]  ;;  %vm221_vm3 = vcmask 523264   ;;  %s545_s1 = smov [#allocation2]  }
   0xa   :  { %493 = vmatprep.subr.bf16.mxu1 %v542_v3  ;;  %v217_v24 = vld [vmem:[%s700_s7 + $0x20] sm:$0xff]  ;;  %v218_v25 = vld [vmem:[%s700_s7 + $0x28] sm:$0xff]  ;;  %459 = vmatprep.mubr.msk.f32.mxu1 %vm543_vm0, %v544_v9  ;;  %v506_v26 = vpack.c.bf16 %v208_v23, %v207_v22  ;;  %v219_v31 = vld [vmem:[%s700_s7 + $0x30] sm:$0xff]  ;;  %s384_s12 = sshll.u32 %s545_s1, 4  ;;  %vm376_vm4 = vcmask 64512   ;;  %s385_s12 = int_to_ptr.vmem [resolvable:$true] %s384_s12 }
   0xb   :  { %434 = vmatmul.mubr.msk.f32.vlgmr.msra.gmra.mrb[0].mxu0 %vm45_vm2, %v33_v19  ;;  %v497_v27 = vpack.c.bf16 %v218_v25, %v217_v24  ;;  %v209_v28 = vld [vmem:[%s699_s6 + $0x20] sm:$0xff]  ;;  %v210_v29 = vld [vmem:[%s699_s6 + $0x28] sm:$0xff]  ;;  %v220_v32 = vld [vmem:[%s700_s7 + $0x38] sm:$0xff]  ;;  %p523_p1 = scmp.lt.s32.totalorder %s385_s12, %s385_s12 }
   0xc   :  { %504 = vmatpush3.bf16.msra.mxu0 %v503_v20  ;;  %478 = vmatprep.mubr.msk.f32.mxu0 %vm543_vm0, %v544_v9  ;;  %v509_v30 = vpack.c.bf16 %v210_v29, %v209_v28  ;;  %v500_v33 = vpack.c.bf16 %v220_v32, %v219_v31  ;;  %v211_v34 = vld [vmem:[%s699_s6 + $0x30] sm:$0xff]  ;;  %v212_v35 = vld [vmem:[%s699_s6 + $0x38] sm:$0xff]  ;;  %v394_v37 = vld [vmem:[%s698_s5] ss:$0 sm:$0xff] }
   0xd   :  { %495 = vmatpush3.bf16.msra.mxu1 %v494_v21  ;;  %505 = vmatprep.subr.bf16.mxu0 %v542_v3  ;;  %v512_v36 = vpack.c.bf16 %v212_v35, %v211_v34  ;;  %v392_v40 = vld [vmem:[%s696_s3] ss:$0 sm:$0xff]  ;;  %s518_s3 = scalar_lea.vmem %s385_s12, 128 }
   0xe   :  { %496 = vmatprep.subr.bf16.mxu1 %v542_v3  ;;  %v398_v50 = vld [vmem:[%s701_s8] ss:$0 sm:$0xff]  ;;  %p519_p0 = scmp.ne.s32.totalorder %s385_s12, %s518_s3  ;;  %p524_p2 = scmp.lt.s32.totalorder %s518_s3, %s518_s3 }
  0x10   :  { %507 = vmatpush3.bf16.msra.mxu0 %v506_v26  ;;  %p525_p3 = por %p524_p2, %p523_p1 }
  0x11   :  { %498 = vmatpush3.bf16.msra.mxu1 %v497_v27  ;;  %508 = vmatprep.subr.bf16.mxu0 %v542_v3 }
  0x12   :  { %499 = vmatprep.subr.bf16.mxu1 %v542_v3  ;;  %p526_p4 = pnand %p525_p3, %p519_p0 }
  0x14   :  { %510 = vmatpush3.bf16.msra.mxu0 %v509_v30 }
  0x15   :  { %511 = vmatprep.subr.bf16.mxu0 %v542_v3  ;;  %501 = vmatpush3.bf16.msra.mxu1 %v500_v33 }
  0x18   :  { %513 = vmatpush3.bf16.msra.mxu0 %v512_v36 }
  0xdb   :  { %v200_v38 = vpop.f32.mrb[0].mxu1 }
  0xdc   :  { %v201_v39 = vadd.f32 %v394_v37, %v200_v38  ;;  %v442_v41 = vpop.f32.mrb[1].mxu1 }
  0xde   :  { %v204_v42 = vmax.f32 %v201_v39, 0.0  ;;  %v115_v43 = vpop.f32.mrb[0].mxu0 }
  0xdf   :  { %v116_v44 = vadd.f32 %v392_v40, %v115_v43  ;;  %v435_v45 = vpop.f32.mrb[1].mxu0 }
  0xe0   :  { %460 = vmatmul.mubr.msk.f32.vlgmr.msra.gmra.mrb[2].mxu1 %vm221_vm3, %v204_v42 }
  0xe1   :  { %v119_v46 = vmax.f32 %v116_v44, 0.0 }
  0xe3   :  { %479 = vmatmul.mubr.msk.f32.vlgmr.msra.gmra.mrb[2].mxu0 %vm221_vm3, %v119_v46 }
 0x1b3   :  { %v291_v47 = vpop.f32.mrb[2].mxu1 }
 0x1b4   :  { %v461_v48 = vpop.f32.mrb[3].mxu1 }
 0x1b6   :  { %v364_v49 = vpop.f32.mrb[2].mxu0 }
 0x1b7   :  { %v365_v51 = vadd.f32 %v364_v49, %v291_v47  ;;  %v480_v52 = vpop.f32.mrb[3].mxu0 }
 0x1b9   :  { %v375_v53 = vadd.f32 %v398_v50, %v365_v51 }
 0x1bb   :  { %377 = vst.msk [vmem:[#allocation2] sm:$0xff] %vm376_vm4, %v375_v53 }
 0x1bc   :  { %529 = shalt.err (!%p526_p4)
}
 0x1bd   :  { %s530_s15 = scalar_lea.hbm %s702_s9, 128 }
 0x1be   :  { %p531_p5 = scmp.ne.s32.totalorder %s702_s9, %s530_s15  ;;  %p534_p6 = scmp.lt.u32.totalorder %s530_s15, %s702_s9 }
 0x1c0   :  { %p536_p7 = pnand %p534_p6, %p531_p5 }
 0x1c2   :  { %539 = shalt.err (!%p536_p7)
}
 0x1c3   :  { %387 = dma.vmem_to_hbm [thread:$0]  %s385_s12, 128, %s702_s9, [#allocation3]  }
 0x1c4   :  { %540 = dma.done.wait [#allocation3], 128  }
 0x1c5   :  { %541 = vsyncadd [#allocation3], 4294967168 }
 0x1c6   :  { %391 = vsyncpa [#allocation3], 1 }

</bundles_post_ra>
